<compile_context>
chip_gen: v7x
topology: tpu7x:2x2x1
jax: 0.10.0
libtpu: 0.0.40
codegen_flags: <defaults>
</compile_context>

<pallas_src>
import functools

import jax
import jax.numpy as jnp
from jax.experimental import pallas as pl
from jax.experimental.pallas import tpu as pltpu


def _round_up(v, m):
    return ((v + m - 1) // m) * m


def _cdiv(a, b):
    return -(-a // b)


def _vmem_limit_bytes():
    cap = 64 * 1024 * 1024  # conservative default (v7x per-TensorCore VMEM)
    try:
        info = pltpu.get_tpu_info()
        cap = int(getattr(info, "vmem_capacity_bytes", cap))
    except Exception:
        pass
    # v5e/v6e (128 MiB) -> 96 MiB scoped; v7x (64 MiB) -> 48 MiB scoped.
    return min((cap // 4) * 3, 100 * 1024 * 1024)


def _pick_spatial_tile(rows, s_max, itemsize, vmem_limit):
    # 2 double-buffered input tiles of (rows, s_tile) must stay well under the
    # scoped VMEM limit; leave the other half for outputs / compiler scratch.
    budget = vmem_limit // 2
    per_lane = max(rows * itemsize * 2, 1)
    tile = (budget // per_lane) // 128 * 128
    tile = min(tile, 16 * 1024, _round_up(s_max, 128))
    return max(128, tile)


def _input_tile(s, s_tile_base):
    """Per-input tile width + step count (never wider than the input itself)."""
    if _round_up(s, 128) <= s_tile_base:
        return s, 1                       # single full-width block
    return s_tile_base, _cdiv(s, s_tile_base)


# ---------------------------------------------------------------------------
# Phase 1: streamed spatial sum-pool, VPU-only per step.
# ---------------------------------------------------------------------------
def _pool_accumulate(in_ref, acc_ref, k, tile_w, s_total):
    """Fold one (rows, tile_w) tile into the lane-dense (rows, 128) accumulator."""
    base = k * tile_w
    ragged = (s_total % tile_w) != 0      # static: mask only if a tail exists
    n_chunks = _cdiv(tile_w, 128)
    for mc in range(n_chunks):
        lo = mc * 128
        w = min(128, tile_w - lo)
        chunk = in_ref[:, lo:lo + w].astype(jnp.float32)
        if ragged:
            pos = base + lo + jax.lax.broadcasted_iota(jnp.int32, chunk.shape, 1)
            chunk = jnp.where(pos < s_total, chunk, 0.0)
        if w == 128:
            acc_ref[...] = acc_ref[...] + chunk            # dense 128-lane store
        else:
            acc_ref[:, 0:w] = acc_ref[:, 0:w] + chunk      # tail-only narrow store


def _pool_kernel(x_ref, y_ref, xa_ref, ya_ref, *, s_x, s_y, tw_x, tw_y,
                 nt_x, nt_y):
    k = pl.program_id(0)

    @pl.when(k == 0)
    def _init():
        xa_ref[...] = jnp.zeros_like(xa_ref)
        ya_ref[...] = jnp.zeros_like(ya_ref)

    @pl.when(k < nt_x)
    def _acc_x():
        _pool_accumulate(x_ref, xa_ref, k, tw_x, s_x)

    @pl.when(k < nt_y)
    def _acc_y():
        _pool_accumulate(y_ref, ya_ref, k, tw_y, s_y)


# ---------------------------------------------------------------------------
# Phase 2: tiled pairwise gaussian-kernel MMD (shared by both paths).
# ---------------------------------------------------------------------------
def _pairwise_mmd_kernel(zr_ref, zc_ref, o_ref, *, n, m, dim):
    i = pl.program_id(0)
    j = pl.program_id(1)

    @pl.when(jnp.logical_and(i == 0, j == 0))
    def _init():
        o_ref[...] = jnp.zeros_like(o_ref)

    zi = zr_ref[...]                                        # (tr, C) f32
    zj = zc_ref[...]                                        # (tc, C) f32
    tr, tc = zi.shape[0], zj.shape[0]
    g = jax.lax.dot_general(zi, zj, (((1,), (1,)), ((), ())),
                            preferred_element_type=jnp.float32)      # (tr, tc)
    # Row-tile norms: one lane reduce.  Column-tile norms laid out along lanes
    # via a tiny MXU matvec (avoids a (tc,1)->(1,tc) transpose and a second
    # masked-diag reduction of the gram).
    sq_r = jnp.sum(zi * zi, axis=1, keepdims=True)                   # (tr, 1)
    sq_c = jax.lax.dot_general(jnp.ones((1, zj.shape[1]), jnp.float32), zj * zj,
                               (((1,), (1,)), ((), ())),
                               preferred_element_type=jnp.float32)   # (1, tc)
    sq = jnp.maximum(sq_r + sq_c - 2.0 * g, 0.0)            # ||zi - zj||^2
    # kernel_input = mean_d (zi-zj)^2 / dim = ||zi-zj||^2 / dim^2
    kmat = jnp.exp(sq * (-1.0 / float(dim * dim)))          # one EUP pass
    # Global-position weights (tiles may straddle the x/y boundary and the
    # zero-padded tail rows, so the boundary mask is needed per tile anyway).
    ri = i * tr + jax.lax.broadcasted_iota(jnp.int32, (tr, tc), 0)
    ci = j * tc + jax.lax.broadcasted_iota(jnp.int32, (tr, tc), 1)
    row_x = ri < n
    col_x = ci < n
    row_y = jnp.logical_and(ri >= n, ri < n + m)
    col_y = jnp.logical_and(ci >= n, ci < n + m)
    w = (jnp.where(jnp.logical_and(row_x, col_x), 1.0 / float(n * n), 0.0)
         + jnp.where(jnp.logical_and(row_y, col_y), 1.0 / float(m * m), 0.0)
         - jnp.where(jnp.logical_and(row_x, col_y), 2.0 / float(n * m), 0.0))
    part = jnp.sum(jnp.sum(w * kmat, axis=1, keepdims=True),
                   axis=0, keepdims=True)
    o_ref[...] = o_ref[...] + part


def _mmd_vectors(x, y):
    n, dx = x.shape
    m, dy = y.shape
    assert dx == dy, "x and y must have the same feature dim"
    d = dx
    p = n + m
    c_pad = _round_up(d, 128)
    t = min(256, _round_up(p, 8))
    p_pad = _round_up(p, t)

    # Lane-dense, zero-padded z = [x; y] (tiny, layout plumbing only).
    z = jnp.zeros((p_pad, c_pad), jnp.float32)
    z = jax.lax.dynamic_update_slice(z, x.astype(jnp.float32), (0, 0))
    z = jax.lax.dynamic_update_slice(z, y.astype(jnp.float32), (n, 0))

    vlim = _vmem_limit_bytes()
    gt = p_pad // t
    kernel = functools.partial(_pairwise_mmd_kernel, n=n, m=m, dim=d)
    cost = pl.CostEstimate(
        flops=2 * p_pad * p_pad * c_pad + 10 * p_pad * p_pad,
        transcendentals=p_pad * p_pad,
        bytes_accessed=2 * gt * p_pad * c_pad * 4 + 4)

    out = pl.pallas_call(
        kernel,
        out_shape=jax.ShapeDtypeStruct((1, 1), jnp.float32),
        grid=(gt, gt),
        in_specs=[
            pl.BlockSpec((t, c_pad), lambda i, j: (i, 0)),
            pl.BlockSpec((t, c_pad), lambda i, j: (j, 0)),
        ],
        out_specs=pl.BlockSpec((1, 1), lambda i, j: (0, 0)),
        compiler_params=pltpu.CompilerParams(
            dimension_semantics=("arbitrary", "arbitrary"),
            vmem_limit_bytes=vlim),
        cost_estimate=cost,
    )(z, z)
    return out[0, 0]


def _mmd_feature_map(x, y, *, s_tile=None):
    bx, cx, hx, wx = x.shape
    by, cy, hy, wy = y.shape
    assert cx == cy, "x and y must have the same channel count"
    c = cx
    s_x, s_y = hx * wx, hy * wy
    rx, ry = bx * c, by * c
    x2 = x.reshape(rx, s_x)                 # free reshape, no copy
    y2 = y.reshape(ry, s_y)

    vlim = _vmem_limit_bytes()
    itemsize = max(x2.dtype.itemsize, y2.dtype.itemsize)
    if s_tile is None:
        s_tile = _pick_spatial_tile(rx + ry, max(s_x, s_y), itemsize, vlim)
    else:
        s_tile = max(128, _round_up(int(s_tile), 128))

    tw_x, nt_x = _input_tile(s_x, s_tile)
    tw_y, nt_y = _input_tile(s_y, s_tile)
    nt = max(nt_x, nt_y)

    kernel = functools.partial(_pool_kernel, s_x=s_x, s_y=s_y,
                               tw_x=tw_x, tw_y=tw_y, nt_x=nt_x, nt_y=nt_y)
    cost = pl.CostEstimate(
        flops=rx * s_x + ry * s_y,
        transcendentals=0,
        bytes_accessed=(rx * s_x + ry * s_y) * itemsize + (rx + ry) * 128 * 4)

    xa, ya = pl.pallas_call(
        kernel,
        out_shape=(jax.ShapeDtypeStruct((rx, 128), jnp.float32),
                   jax.ShapeDtypeStruct((ry, 128), jnp.float32)),
        grid=(nt,),
        in_specs=[
            # Clamped index maps: once an input's spatial range is exhausted the
            # block index stops changing, so Pallas skips the redundant DMAs.
            pl.BlockSpec((rx, tw_x), lambda k: (0, jnp.minimum(k, nt_x - 1))),
            pl.BlockSpec((ry, tw_y), lambda k: (0, jnp.minimum(k, nt_y - 1))),
        ],
        out_specs=(
            pl.BlockSpec((rx, 128), lambda k: (0, 0)),
            pl.BlockSpec((ry, 128), lambda k: (0, 0)),
        ),
        compiler_params=pltpu.CompilerParams(
            dimension_semantics=("arbitrary",),   # spatial reduction axis
            vmem_limit_bytes=vlim),
        cost_estimate=cost,
    )(x2, y2)

    # Tiny epilogue glue (O(batch*channels*128) elements): finish the 128-lane
    # reduce, relayout (b*c,) -> (b, c) and apply the spatial mean.  All heavy
    # math (streaming reduction, pairwise gram / exp) stays in Pallas.
    x_pool = (jnp.sum(xa, axis=1) * (1.0 / float(s_x))).reshape(bx, c)
    y_pool = (jnp.sum(ya, axis=1) * (1.0 / float(s_y))).reshape(by, c)
    return _mmd_vectors(x_pool, y_pool)


def mmd_loss(x, y, *, is_feature_map, s_tile=None):
    """Pallas implementation of MMDLoss.forward(x, y)."""
    if is_feature_map:
        return _mmd_feature_map(x, y, s_tile=s_tile)
    return _mmd_vectors(x, y)


def _mmd_ref(x, y, *, is_feature_map):
    """Pure-JAX reference mirroring the PyTorch module."""
    if is_feature_map:
        b, c = x.shape[0], x.shape[1]
        x = x.reshape(b, c, -1).transpose(0, 2, 1).mean(axis=1)
        b, c = y.shape[0], y.shape[1]
        y = y.reshape(b, c, -1).transpose(0, 2, 1).mean(axis=1)

    def kern(a, b):
        d = a.shape[1]
        diff = a[:, None, :] - b[None, :, :]
        kin = jnp.mean(diff * diff, axis=2) / float(d)
        return jnp.exp(-kin)

    return kern(x, x).mean() + kern(y, y).mean() - 2.0 * kern(x, y).mean()


if __name__ == "__main__":
    key = jax.random.PRNGKey(0)
    k1, k2, k3, k4, k5, k6 = jax.random.split(key, 6)

    # Feature-map path (NCHW), auto tile size (single-step stream).
    x_fm = jax.random.normal(k1, (2, 4, 16, 16), dtype=jnp.float32)
    y_fm = jax.random.normal(k2, (2, 4, 16, 16), dtype=jnp.float32)
    out_fm = mmd_loss(x_fm, y_fm, is_feature_map=True)
    jax.block_until_ready(out_fm)
    ref_fm = _mmd_ref(x_fm, y_fm, is_feature_map=True)
    assert jnp.allclose(out_fm, ref_fm, atol=2e-5, rtol=1e-4), (out_fm, ref_fm)

    # Forced small spatial tile: multi-step streaming on x, short/narrow y with
    # a different batch & spatial size (exercises gating, clamped index_map and
    # the sub-128-lane tail path).
    x_fm2 = jax.random.normal(k3, (2, 4, 16, 16), dtype=jnp.float32)
    y_fm2 = jax.random.normal(k4, (3, 4, 8, 8), dtype=jnp.float32)
    out_fm2 = mmd_loss(x_fm2, y_fm2, is_feature_map=True, s_tile=128)
    jax.block_until_ready(out_fm2)
    ref_fm2 = _mmd_ref(x_fm2, y_fm2, is_feature_map=True)
    assert jnp.allclose(out_fm2, ref_fm2, atol=2e-5, rtol=1e-4), (out_fm2, ref_fm2)

    # Plain-vector path, different batch sizes (tests row masking / padding).
    x_v = jax.random.normal(k5, (8, 32), dtype=jnp.float32)
    y_v = jax.random.normal(k6, (5, 32), dtype=jnp.float32)
    out_v = mmd_loss(x_v, y_v, is_feature_map=False)
    jax.block_until_ready(out_v)
    ref_v = _mmd_ref(x_v, y_v, is_feature_map=False)
    assert jnp.allclose(out_v, ref_v, atol=2e-5, rtol=1e-4), (out_v, ref_v)

    print("KERNEL_OK")
</pallas_src>

<mosaic_0001>
module attributes {stable_mosaic.version = 11 : i64} {
  func.func @_pool_kernel(%arg0: i32, %arg1: memref<8x256xf32, #tpu.memory_space<vmem>>, %arg2: memref<8x256xf32, #tpu.memory_space<vmem>>, %arg3: memref<8x128xf32, #tpu.memory_space<vmem>>, %arg4: memref<8x128xf32, #tpu.memory_space<vmem>>) attributes {dimension_semantics = [#tpu.dimension_semantics<arbitrary>], iteration_bounds = array<i64: 1>, scalar_prefetch = 0 : i64, scratch_operands = 0 : i64, tpu.core_type = #tpu.core_type<tc>, window_params = [{transform_indices = @transform_0, window_bounds = array<i64: 8, 256>}, {transform_indices = @transform_1, window_bounds = array<i64: 8, 256>}, {pipeline_mode = #tpu.pipeline_mode<synchronous>, transform_indices = @transform_2, window_bounds = array<i64: 8, 128>}, {pipeline_mode = #tpu.pipeline_mode<synchronous>, transform_indices = @transform_3, window_bounds = array<i64: 8, 128>}]} {
    %c0_i32 = arith.constant 0 : i32
    %0 = arith.cmpi eq, %arg0, %c0_i32 : i32
    %1 = arith.extui %0 : i1 to i32
    %c0_i32_0 = arith.constant 0 : i32
    %2 = arith.cmpi ne, %1, %c0_i32_0 : i32
    scf.if %2 {
      %cst = arith.constant 0.000000e+00 : f32
      %9 = vector.broadcast %cst : f32 to vector<8x128xf32>
      %c0 = arith.constant 0 : index
      %c0_4 = arith.constant 0 : index
      %10 = vector.load %arg3[%c0, %c0_4] : memref<8x128xf32, #tpu.memory_space<vmem>>, vector<8x128xf32>
      tpu.vector_store %arg3[%c0, %c0_4], %9 {strides = array<i32>} : memref<8x128xf32, #tpu.memory_space<vmem>>, vector<8x128xf32>,
      %cst_5 = arith.constant 0.000000e+00 : f32
      %11 = vector.broadcast %cst_5 : f32 to vector<8x128xf32>
      %c0_6 = arith.constant 0 : index
      %c0_7 = arith.constant 0 : index
      %12 = vector.load %arg4[%c0_6, %c0_7] : memref<8x128xf32, #tpu.memory_space<vmem>>, vector<8x128xf32>
      tpu.vector_store %arg4[%c0_6, %c0_7], %11 {strides = array<i32>} : memref<8x128xf32, #tpu.memory_space<vmem>>, vector<8x128xf32>,
    } else {
    }
    %c1_i32 = arith.constant 1 : i32
    %3 = arith.cmpi slt, %arg0, %c1_i32 : i32
    %4 = arith.extui %3 : i1 to i32
    %c0_i32_1 = arith.constant 0 : i32
    %5 = arith.cmpi ne, %4, %c0_i32_1 : i32
    scf.if %5 {
      %c0 = arith.constant 0 : index
      %c0_4 = arith.constant 0 : index
      %9 = vector.load %arg1[%c0, %c0_4] : memref<8x256xf32, #tpu.memory_space<vmem>>, vector<8x128xf32>
      %c0_5 = arith.constant 0 : index
      %c0_6 = arith.constant 0 : index
      %10 = vector.load %arg3[%c0_5, %c0_6] : memref<8x128xf32, #tpu.memory_space<vmem>>, vector<8x128xf32>
      %11 = arith.addf %10, %9 : vector<8x128xf32>
      %c0_7 = arith.constant 0 : index
      %c0_8 = arith.constant 0 : index
      %12 = vector.load %arg3[%c0_7, %c0_8] : memref<8x128xf32, #tpu.memory_space<vmem>>, vector<8x128xf32>
      tpu.vector_store %arg3[%c0_7, %c0_8], %11 {strides = array<i32>} : memref<8x128xf32, #tpu.memory_space<vmem>>, vector<8x128xf32>,
      %c0_9 = arith.constant 0 : index
      %c128 = arith.constant 128 : index
      %13 = vector.load %arg1[%c0_9, %c128] : memref<8x256xf32, #tpu.memory_space<vmem>>, vector<8x128xf32>
      %c0_10 = arith.constant 0 : index
      %c0_11 = arith.constant 0 : index
      %14 = vector.load %arg3[%c0_10, %c0_11] : memref<8x128xf32, #tpu.memory_space<vmem>>, vector<8x128xf32>
      %15 = arith.addf %14, %13 : vector<8x128xf32>
      %c0_12 = arith.constant 0 : index
      %c0_13 = arith.constant 0 : index
      %16 = vector.load %arg3[%c0_12, %c0_13] : memref<8x128xf32, #tpu.memory_space<vmem>>, vector<8x128xf32>
      tpu.vector_store %arg3[%c0_12, %c0_13], %15 {strides = array<i32>} : memref<8x128xf32, #tpu.memory_space<vmem>>, vector<8x128xf32>,
    } else {
    }
    %c1_i32_2 = arith.constant 1 : i32
    %6 = arith.cmpi slt, %arg0, %c1_i32_2 : i32
    %7 = arith.extui %6 : i1 to i32
    %c0_i32_3 = arith.constant 0 : i32
    %8 = arith.cmpi ne, %7, %c0_i32_3 : i32
    scf.if %8 {
      %c0 = arith.constant 0 : index
      %c0_4 = arith.constant 0 : index
      %9 = vector.load %arg2[%c0, %c0_4] : memref<8x256xf32, #tpu.memory_space<vmem>>, vector<8x128xf32>
      %c0_5 = arith.constant 0 : index
      %c0_6 = arith.constant 0 : index
      %10 = vector.load %arg4[%c0_5, %c0_6] : memref<8x128xf32, #tpu.memory_space<vmem>>, vector<8x128xf32>
      %11 = arith.addf %10, %9 : vector<8x128xf32>
      %c0_7 = arith.constant 0 : index
      %c0_8 = arith.constant 0 : index
      %12 = vector.load %arg4[%c0_7, %c0_8] : memref<8x128xf32, #tpu.memory_space<vmem>>, vector<8x128xf32>
      tpu.vector_store %arg4[%c0_7, %c0_8], %11 {strides = array<i32>} : memref<8x128xf32, #tpu.memory_space<vmem>>, vector<8x128xf32>,
      %c0_9 = arith.constant 0 : index
      %c128 = arith.constant 128 : index
      %13 = vector.load %arg2[%c0_9, %c128] : memref<8x256xf32, #tpu.memory_space<vmem>>, vector<8x128xf32>
      %c0_10 = arith.constant 0 : index
      %c0_11 = arith.constant 0 : index
      %14 = vector.load %arg4[%c0_10, %c0_11] : memref<8x128xf32, #tpu.memory_space<vmem>>, vector<8x128xf32>
      %15 = arith.addf %14, %13 : vector<8x128xf32>
      %c0_12 = arith.constant 0 : index
      %c0_13 = arith.constant 0 : index
      %16 = vector.load %arg4[%c0_12, %c0_13] : memref<8x128xf32, #tpu.memory_space<vmem>>, vector<8x128xf32>
      tpu.vector_store %arg4[%c0_12, %c0_13], %15 {strides = array<i32>} : memref<8x128xf32, #tpu.memory_space<vmem>>, vector<8x128xf32>,
    } else {
    }
    return
  }
  func.func @transform_0(%arg0: i32) -> (i32, i32) {
    %c0_i32 = arith.constant 0 : i32
    %0 = arith.minsi %arg0, %c0_i32 : i32
    %c0_i32_0 = arith.constant 0 : i32
    %c0_i32_1 = arith.constant 0 : i32
    return %c0_i32_0, %0 : i32, i32
  }
  func.func @transform_1(%arg0: i32) -> (i32, i32) {
    %c0_i32 = arith.constant 0 : i32
    %0 = arith.minsi %arg0, %c0_i32 : i32
    %c0_i32_0 = arith.constant 0 : i32
    %c0_i32_1 = arith.constant 0 : i32
    return %c0_i32_0, %0 : i32, i32
  }
  func.func @transform_2(%arg0: i32) -> (i32, i32) {
    %c0_i32 = arith.constant 0 : i32
    %c0_i32_0 = arith.constant 0 : i32
    %c0_i32_1 = arith.constant 0 : i32
    return %c0_i32, %c0_i32_0 : i32, i32
  }
  func.func @transform_3(%arg0: i32) -> (i32, i32) {
    %c0_i32 = arith.constant 0 : i32
    %c0_i32_0 = arith.constant 0 : i32
    %c0_i32_1 = arith.constant 0 : i32
    return %c0_i32, %c0_i32_0 : i32, i32
  }
}

</mosaic_0001>

<bundles_post_ra>
// kernel: tpu_custom_call.1
= control target key start
LH: loop header
LB: loop body
LE: loop exit
PB: predicated region body
PF: predicated region fallthrough
CT: control target
= control target key end

     0   :  { %9 = vsyncpa [#allocation3], 0  ;;  %s268_s0 = inlined_call_operand.hbm [shape: f32[8,256], index: 0, kind: input, shape index: {}]   ;;  %s269_s1 = inlined_call_operand.hbm [shape: f32[8,256], index: 1, kind: input, shape index: {}]   ;;  %s270_s2 = inlined_call_operand.hbm [shape: f32[8,128], index: 2, kind: output, shape index: {0}]   ;;  %s271_s3 = inlined_call_operand.hbm [shape: f32[8,128], index: 3, kind: output, shape index: {1}]  }
   0x1   :  { %10 = vsyncpa [#allocation6], 0 }
   0x2   :  { %11 = vsyncpa [#allocation4], 0 }
   0x3   :  { %12 = vsyncpa [#allocation9], 0  ;;  %s196_s12 = smov [#allocation2]   ;;  %s197_s14 = smov [#allocation5]  }
   0x4   :  { %s19_s13 = sshll.u32 %s196_s12, 4  ;;  %s29_s15 = sshll.u32 %s197_s14, 4  ;;  %s20_s13 = int_to_ptr.vmem [resolvable:$true] %s19_s13  ;;  %s30_s15 = int_to_ptr.vmem [resolvable:$true] %s29_s15 }
   0x5   :  { %s100_s18 = scalar_lea.hbm %s268_s0, 256 }
   0x6   :  { %p101_p0 = scmp.ne.s32.totalorder %s268_s0, %s100_s18  ;;  %p104_p1 = scmp.lt.u32.totalorder %s100_s18, %s268_s0 }
   0x8   :  { %p106_p2 = pnand %p104_p1, %p101_p0 }
   0xa   :  { %109 = shalt.err (!%p106_p2)
}
   0xb   :  { %s110_s23 = scalar_lea.vmem %s20_s13, 256  ;;  %p115_p4 = scmp.lt.s32.totalorder %s20_s13, %s20_s13 }
   0xc   :  { %p111_p3 = scmp.ne.s32.totalorder %s20_s13, %s110_s23  ;;  %p116_p5 = scmp.lt.s32.totalorder %s110_s23, %s110_s23 }
   0xe   :  { %p117_p6 = por %p116_p5, %p115_p4 }
  0x10   :  { %p118_p7 = pnand %p117_p6, %p111_p3 }
  0x12   :  { %121 = shalt.err (!%p118_p7)
}
  0x13   :  { %22 = dma.hbm_to_vmem [thread:$0]  %s268_s0, 256, %s20_s13, [#allocation3]  }
  0x14   :  { %s122_s28 = scalar_lea.hbm %s269_s1, 256 }
  0x15   :  { %p123_p8 = scmp.ne.s32.totalorder %s269_s1, %s122_s28  ;;  %p126_p9 = scmp.lt.u32.totalorder %s122_s28, %s269_s1 }
  0x17   :  { %p128_p10 = pnand %p126_p9, %p123_p8 }
  0x19   :  { %131 = shalt.err (!%p128_p10)
}
  0x1a   :  { %s132_s6 = scalar_lea.vmem %s30_s15, 256  ;;  %p137_p12 = scmp.lt.s32.totalorder %s30_s15, %s30_s15 }
  0x1b   :  { %p133_p11 = scmp.ne.s32.totalorder %s30_s15, %s132_s6  ;;  %p138_p13 = scmp.lt.s32.totalorder %s132_s6, %s132_s6 }
  0x1d   :  { %p139_p0 = por %p138_p13, %p137_p12 }
  0x1f   :  { %p140_p1 = pnand %p139_p0, %p133_p11 }
  0x21   :  { %143 = shalt.err (!%p140_p1)
}
  0x22   :  { %32 = dma.hbm_to_vmem [thread:$0]  %s269_s1, 256, %s30_s15, [#allocation6]  }
  0x23   :  { %188 = dma.done.wait [#allocation3], 256  }
  0x24   :  { %189 = vsyncadd [#allocation3], 4294967040 }
  0x25   :  { %190 = dma.done.wait [#allocation6], 256  }
  0x26   :  { %191 = vsyncadd [#allocation6], 4294967040  ;;  %v49_v0 = vld [vmem:[#allocation2] sm:$0xff]  ;;  %v57_v1 = vld [vmem:[#allocation5] sm:$0xff]  ;;  %s198_s8 = smov [#allocation7]   ;;  %s199_s10 = smov [#allocation8]  }
  0x27   :  { %v53_v2 = vld [vmem:[#allocation2 + $0x8] sm:$0xff]  ;;  %s71_s9 = sshll.u32 %s198_s8, 4  ;;  %v61_v3 = vld [vmem:[#allocation5 + $0x8] sm:$0xff]  ;;  %s81_s11 = sshll.u32 %s199_s10, 4  ;;  %s72_s9 = int_to_ptr.vmem [resolvable:$true] %s71_s9  ;;  %s82_s11 = int_to_ptr.vmem [resolvable:$true] %s81_s11 }
  0x28   :  { %v55_v4 = vadd.f32 %v53_v2, %v49_v0  ;;  %v63_v5 = vadd.f32 %v61_v3, %v57_v1  ;;  %s144_s12 = scalar_lea.vmem %s72_s9, 128  ;;  %p149_p3 = scmp.lt.s32.totalorder %s72_s9, %s72_s9 }
  0x29   :  { %p145_p2 = scmp.ne.s32.totalorder %s72_s9, %s144_s12  ;;  %p150_p4 = scmp.lt.s32.totalorder %s144_s12, %s144_s12 }
  0x2a   :  { %56 = vst [vmem:[#allocation7] sm:$0xff] %v55_v4  ;;  %64 = vst [vmem:[#allocation8] sm:$0xff] %v63_v5 }
  0x2b   :  { %p151_p5 = por %p150_p4, %p149_p3 }
  0x2d   :  { %p152_p6 = pnand %p151_p5, %p145_p2 }
  0x2f   :  { %155 = shalt.err (!%p152_p6)
}
  0x30   :  { %s156_s14 = scalar_lea.hbm %s270_s2, 128 }
  0x31   :  { %p157_p7 = scmp.ne.s32.totalorder %s270_s2, %s156_s14  ;;  %p160_p8 = scmp.lt.u32.totalorder %s156_s14, %s270_s2 }
  0x33   :  { %p162_p9 = pnand %p160_p8, %p157_p7 }
  0x35   :  { %165 = shalt.err (!%p162_p9)
}
  0x36   :  { %74 = dma.vmem_to_hbm [thread:$0]  %s72_s9, 128, %s270_s2, [#allocation4]  }
  0x37   :  { %s166_s21 = scalar_lea.vmem %s82_s11, 128  ;;  %p171_p11 = scmp.lt.s32.totalorder %s82_s11, %s82_s11 }
  0x38   :  { %p167_p10 = scmp.ne.s32.totalorder %s82_s11, %s166_s21  ;;  %p172_p12 = scmp.lt.s32.totalorder %s166_s21, %s166_s21 }
  0x3a   :  { %p173_p13 = por %p172_p12, %p171_p11 }
  0x3c   :  { %p174_p0 = pnand %p173_p13, %p167_p10 }
  0x3e   :  { %177 = shalt.err (!%p174_p0)
}
  0x3f   :  { %s178_s24 = scalar_lea.hbm %s271_s3, 128 }
  0x40   :  { %p179_p1 = scmp.ne.s32.totalorder %s271_s3, %s178_s24  ;;  %p182_p2 = scmp.lt.u32.totalorder %s178_s24, %s271_s3 }
  0x42   :  { %p184_p3 = pnand %p182_p2, %p179_p1 }
  0x44   :  { %187 = shalt.err (!%p184_p3)
}
  0x45   :  { %84 = dma.vmem_to_hbm [thread:$0]  %s82_s11, 128, %s271_s3, [#allocation9]  }
  0x46   :  { %192 = dma.done.wait [#allocation4], 128  }
  0x47   :  { %193 = vsyncadd [#allocation4], 4294967168 }
  0x48   :  { %194 = dma.done.wait [#allocation9], 128  }
  0x49   :  { %195 = vsyncadd [#allocation9], 4294967168 }
  0x4a   :  { %91 = vsyncpa [#allocation3], 1 }
  0x4b   :  { %92 = vsyncpa [#allocation6], 1 }
  0x4c   :  { %93 = vsyncpa [#allocation4], 1 }
  0x4d   :  { %94 = vsyncpa [#allocation9], 1 }

</bundles_post_ra>
